<compile_context>
chip_gen: v7x
topology: tpu7x:2x2x1
jax: 0.10.0
libtpu: 0.0.40
codegen_flags: <defaults>
</compile_context>

<pallas_src>
import functools

import jax
import jax.numpy as jnp
from jax.experimental import pallas as pl
from jax.experimental.pallas import tpu as pltpu


def mlp_policy_kernel(x_ref, p_ref, out_ref, *, obs_dim, hid, act_dim):
    x = x_ref[...]          # [B, obs_dim]
    p = p_ref[...]          # packed param slab [rows, hid]

    # Static-row-offset views into the packed slab.
    r = 0
    w1 = p[r:r + obs_dim, :hid]; r += obs_dim     # [obs_dim, hid]
    b1 = p[r:r + 1, :hid];       r += 1           # [1, hid]
    w2 = p[r:r + hid, :hid];     r += hid         # [hid, hid]
    b2 = p[r:r + 1, :hid];       r += 1           # [1, hid]
    w3 = p[r:r + hid, :act_dim]; r += hid         # [hid, act_dim]
    b3 = p[r:r + 1, :act_dim];   r += 1           # [1, act_dim]

    def dense(xin, w, b):
        # Tiny K/N: unrolled VPU broadcast-MACs instead of a padded MXU matmul.
        acc = jnp.broadcast_to(b, (xin.shape[0], w.shape[1]))
        for k in range(w.shape[0]):               # static unroll (K <= 4)
            acc = acc + xin[:, k:k + 1] * w[k:k + 1, :]
        return acc

    h1 = jnp.tanh(dense(x, w1, b1))
    h2 = jnp.tanh(dense(h1, w2, b2))
    logits = dense(h2, w3, b3)

    # Numerically-stable softmax over the action axis.
    m = jnp.max(logits, axis=-1, keepdims=True)
    e = jnp.exp(logits - m)
    denom = jnp.sum(e, axis=-1, keepdims=True)
    out_ref[...] = e * pl.reciprocal(denom)       # exact (approx=False default)


def pack_params(params, hid):
    """Concatenate w1|b1|w2|b2|w3|b3 row-wise into one [rows, hid] f32 slab."""
    def pad_cols(a):
        return jnp.pad(a, ((0, 0), (0, hid - a.shape[1])))
    return jnp.concatenate([pad_cols(a) for a in params], axis=0)


def mlp_policy(x, params):
    """x: [B, obs_dim] float32 -> probs: [B, act_dim] float32."""
    w1, b1, w2, b2, w3, b3 = params
    obs_dim, hid = w1.shape
    act_dim = w3.shape[1]
    B = x.shape[0]

    slab = pack_params(params, hid)

    vmem = pl.BlockSpec(memory_space=pltpu.MemorySpace.VMEM)
    kernel = functools.partial(
        mlp_policy_kernel, obs_dim=obs_dim, hid=hid, act_dim=act_dim)

    return pl.pallas_call(
        kernel,
        out_shape=jax.ShapeDtypeStruct((B, act_dim), jnp.float32),
        in_specs=[vmem, vmem],
        out_specs=vmem,
    )(x, slab)


def init_params(key, obs_dim, act_dim):
    """Deterministic parameter init matching the PyTorch module's shapes.

    Weights are stored as [in_features, out_features] (transpose of
    nn.Linear's [out, in]); biases as [1, out_features].
    """
    hid1_size = act_dim * 2
    ks = jax.random.split(key, 6)

    def linear(kw, kb, fan_in, fan_out):
        bound = 1.0 / jnp.sqrt(jnp.float32(fan_in))
        w = jax.random.uniform(kw, (fan_in, fan_out), jnp.float32,
                               minval=-bound, maxval=bound)
        b = jax.random.uniform(kb, (1, fan_out), jnp.float32,
                               minval=-bound, maxval=bound)
        return w, b

    w1, b1 = linear(ks[0], ks[1], obs_dim, hid1_size)
    w2, b2 = linear(ks[2], ks[3], hid1_size, hid1_size)
    w3, b3 = linear(ks[4], ks[5], hid1_size, act_dim)
    return (w1, b1, w2, b2, w3, b3)


def mlp_policy_ref(x, params):
    """Pure-JAX reference for correctness checking."""
    w1, b1, w2, b2, w3, b3 = params
    h1 = jnp.tanh(x @ w1 + b1)
    h2 = jnp.tanh(h1 @ w2 + b2)
    return jax.nn.softmax(h2 @ w3 + b3, axis=-1)


if __name__ == "__main__":
    obs_dim = 4   # Cartpole observation dim
    act_dim = 2   # Cartpole action dim
    batch = 8

    key = jax.random.PRNGKey(0)
    k_x, k_p = jax.random.split(key)
    x = jax.random.normal(k_x, (batch, obs_dim), jnp.float32)
    params = init_params(k_p, obs_dim, act_dim)

    probs = mlp_policy(x, params)
    jax.block_until_ready(probs)

    ref = mlp_policy_ref(x, params)
    assert probs.shape == (batch, act_dim)
    assert jnp.allclose(probs, ref, atol=1e-5, rtol=1e-5), "mismatch vs reference"
    assert jnp.allclose(jnp.sum(probs, axis=-1), 1.0, atol=1e-5), "rows must sum to 1"

    print("KERNEL_OK")
</pallas_src>

<mosaic_0001>
module attributes {stable_mosaic.version = 11 : i64} {
  func.func @mlp_policy_kernel(%arg0: memref<8x4xf32, #tpu.memory_space<vmem>>, %arg1: memref<15x4xf32, #tpu.memory_space<vmem>>, %arg2: memref<8x2xf32, #tpu.memory_space<vmem>>) attributes {dimension_semantics = [], scalar_prefetch = 0 : i64, scratch_operands = 0 : i64, tpu.core_type = #tpu.core_type<tc>} {
    %c0 = arith.constant 0 : index
    %c0_0 = arith.constant 0 : index
    %0 = vector.load %arg0[%c0, %c0_0] : memref<8x4xf32, #tpu.memory_space<vmem>>, vector<8x4xf32>
    %c0_1 = arith.constant 0 : index
    %c0_2 = arith.constant 0 : index
    %1 = vector.load %arg1[%c0_1, %c0_2] : memref<15x4xf32, #tpu.memory_space<vmem>>, vector<15x4xf32>
    %2 = vector.extract_strided_slice %1 {offsets = [0, 0], sizes = [4, 4], strides = [1, 1]} : vector<15x4xf32> to vector<4x4xf32>
    %3 = vector.extract_strided_slice %1 {offsets = [4, 0], sizes = [1, 4], strides = [1, 1]} : vector<15x4xf32> to vector<1x4xf32>
    %4 = vector.extract_strided_slice %1 {offsets = [5, 0], sizes = [4, 4], strides = [1, 1]} : vector<15x4xf32> to vector<4x4xf32>
    %5 = vector.extract_strided_slice %1 {offsets = [9, 0], sizes = [1, 4], strides = [1, 1]} : vector<15x4xf32> to vector<1x4xf32>
    %6 = vector.extract_strided_slice %1 {offsets = [10, 0], sizes = [4, 2], strides = [1, 1]} : vector<15x4xf32> to vector<4x2xf32>
    %7 = vector.extract_strided_slice %1 {offsets = [14, 0], sizes = [1, 2], strides = [1, 1]} : vector<15x4xf32> to vector<1x2xf32>
    %8 = vector.shape_cast %3 : vector<1x4xf32> to vector<1x4xf32>
    %9 = vector.broadcast %8 : vector<1x4xf32> to vector<8x4xf32>
    %10 = vector.extract_strided_slice %0 {offsets = [0, 0], sizes = [8, 1], strides = [1, 1]} : vector<8x4xf32> to vector<8x1xf32>
    %11 = vector.extract_strided_slice %2 {offsets = [0, 0], sizes = [1, 4], strides = [1, 1]} : vector<4x4xf32> to vector<1x4xf32>
    %12 = vector.broadcast %10 : vector<8x1xf32> to vector<8x4xf32>
    %13 = vector.broadcast %11 : vector<1x4xf32> to vector<8x4xf32>
    %14 = arith.mulf %12, %13 : vector<8x4xf32>
    %15 = arith.addf %9, %14 : vector<8x4xf32>
    %16 = vector.extract_strided_slice %0 {offsets = [0, 1], sizes = [8, 1], strides = [1, 1]} : vector<8x4xf32> to vector<8x1xf32>
    %17 = vector.extract_strided_slice %2 {offsets = [1, 0], sizes = [1, 4], strides = [1, 1]} : vector<4x4xf32> to vector<1x4xf32>
    %18 = vector.broadcast %16 : vector<8x1xf32> to vector<8x4xf32>
    %19 = vector.broadcast %17 : vector<1x4xf32> to vector<8x4xf32>
    %20 = arith.mulf %18, %19 : vector<8x4xf32>
    %21 = arith.addf %15, %20 : vector<8x4xf32>
    %22 = vector.extract_strided_slice %0 {offsets = [0, 2], sizes = [8, 1], strides = [1, 1]} : vector<8x4xf32> to vector<8x1xf32>
    %23 = vector.extract_strided_slice %2 {offsets = [2, 0], sizes = [1, 4], strides = [1, 1]} : vector<4x4xf32> to vector<1x4xf32>
    %24 = vector.broadcast %22 : vector<8x1xf32> to vector<8x4xf32>
    %25 = vector.broadcast %23 : vector<1x4xf32> to vector<8x4xf32>
    %26 = arith.mulf %24, %25 : vector<8x4xf32>
    %27 = arith.addf %21, %26 : vector<8x4xf32>
    %28 = vector.extract_strided_slice %0 {offsets = [0, 3], sizes = [8, 1], strides = [1, 1]} : vector<8x4xf32> to vector<8x1xf32>
    %29 = vector.extract_strided_slice %2 {offsets = [3, 0], sizes = [1, 4], strides = [1, 1]} : vector<4x4xf32> to vector<1x4xf32>
    %30 = vector.broadcast %28 : vector<8x1xf32> to vector<8x4xf32>
    %31 = vector.broadcast %29 : vector<1x4xf32> to vector<8x4xf32>
    %32 = arith.mulf %30, %31 : vector<8x4xf32>
    %33 = arith.addf %27, %32 : vector<8x4xf32>
    %34 = math.tanh %33 : vector<8x4xf32>
    %35 = vector.shape_cast %5 : vector<1x4xf32> to vector<1x4xf32>
    %36 = vector.broadcast %35 : vector<1x4xf32> to vector<8x4xf32>
    %37 = vector.extract_strided_slice %34 {offsets = [0, 0], sizes = [8, 1], strides = [1, 1]} : vector<8x4xf32> to vector<8x1xf32>
    %38 = vector.extract_strided_slice %4 {offsets = [0, 0], sizes = [1, 4], strides = [1, 1]} : vector<4x4xf32> to vector<1x4xf32>
    %39 = vector.broadcast %37 : vector<8x1xf32> to vector<8x4xf32>
    %40 = vector.broadcast %38 : vector<1x4xf32> to vector<8x4xf32>
    %41 = arith.mulf %39, %40 : vector<8x4xf32>
    %42 = arith.addf %36, %41 : vector<8x4xf32>
    %43 = vector.extract_strided_slice %34 {offsets = [0, 1], sizes = [8, 1], strides = [1, 1]} : vector<8x4xf32> to vector<8x1xf32>
    %44 = vector.extract_strided_slice %4 {offsets = [1, 0], sizes = [1, 4], strides = [1, 1]} : vector<4x4xf32> to vector<1x4xf32>
    %45 = vector.broadcast %43 : vector<8x1xf32> to vector<8x4xf32>
    %46 = vector.broadcast %44 : vector<1x4xf32> to vector<8x4xf32>
    %47 = arith.mulf %45, %46 : vector<8x4xf32>
    %48 = arith.addf %42, %47 : vector<8x4xf32>
    %49 = vector.extract_strided_slice %34 {offsets = [0, 2], sizes = [8, 1], strides = [1, 1]} : vector<8x4xf32> to vector<8x1xf32>
    %50 = vector.extract_strided_slice %4 {offsets = [2, 0], sizes = [1, 4], strides = [1, 1]} : vector<4x4xf32> to vector<1x4xf32>
    %51 = vector.broadcast %49 : vector<8x1xf32> to vector<8x4xf32>
    %52 = vector.broadcast %50 : vector<1x4xf32> to vector<8x4xf32>
    %53 = arith.mulf %51, %52 : vector<8x4xf32>
    %54 = arith.addf %48, %53 : vector<8x4xf32>
    %55 = vector.extract_strided_slice %34 {offsets = [0, 3], sizes = [8, 1], strides = [1, 1]} : vector<8x4xf32> to vector<8x1xf32>
    %56 = vector.extract_strided_slice %4 {offsets = [3, 0], sizes = [1, 4], strides = [1, 1]} : vector<4x4xf32> to vector<1x4xf32>
    %57 = vector.broadcast %55 : vector<8x1xf32> to vector<8x4xf32>
    %58 = vector.broadcast %56 : vector<1x4xf32> to vector<8x4xf32>
    %59 = arith.mulf %57, %58 : vector<8x4xf32>
    %60 = arith.addf %54, %59 : vector<8x4xf32>
    %61 = math.tanh %60 : vector<8x4xf32>
    %62 = vector.shape_cast %7 : vector<1x2xf32> to vector<1x2xf32>
    %63 = vector.broadcast %62 : vector<1x2xf32> to vector<8x2xf32>
    %64 = vector.extract_strided_slice %61 {offsets = [0, 0], sizes = [8, 1], strides = [1, 1]} : vector<8x4xf32> to vector<8x1xf32>
    %65 = vector.extract_strided_slice %6 {offsets = [0, 0], sizes = [1, 2], strides = [1, 1]} : vector<4x2xf32> to vector<1x2xf32>
    %66 = vector.broadcast %64 : vector<8x1xf32> to vector<8x2xf32>
    %67 = vector.broadcast %65 : vector<1x2xf32> to vector<8x2xf32>
    %68 = arith.mulf %66, %67 : vector<8x2xf32>
    %69 = arith.addf %63, %68 : vector<8x2xf32>
    %70 = vector.extract_strided_slice %61 {offsets = [0, 1], sizes = [8, 1], strides = [1, 1]} : vector<8x4xf32> to vector<8x1xf32>
    %71 = vector.extract_strided_slice %6 {offsets = [1, 0], sizes = [1, 2], strides = [1, 1]} : vector<4x2xf32> to vector<1x2xf32>
    %72 = vector.broadcast %70 : vector<8x1xf32> to vector<8x2xf32>
    %73 = vector.broadcast %71 : vector<1x2xf32> to vector<8x2xf32>
    %74 = arith.mulf %72, %73 : vector<8x2xf32>
    %75 = arith.addf %69, %74 : vector<8x2xf32>
    %76 = vector.extract_strided_slice %61 {offsets = [0, 2], sizes = [8, 1], strides = [1, 1]} : vector<8x4xf32> to vector<8x1xf32>
    %77 = vector.extract_strided_slice %6 {offsets = [2, 0], sizes = [1, 2], strides = [1, 1]} : vector<4x2xf32> to vector<1x2xf32>
    %78 = vector.broadcast %76 : vector<8x1xf32> to vector<8x2xf32>
    %79 = vector.broadcast %77 : vector<1x2xf32> to vector<8x2xf32>
    %80 = arith.mulf %78, %79 : vector<8x2xf32>
    %81 = arith.addf %75, %80 : vector<8x2xf32>
    %82 = vector.extract_strided_slice %61 {offsets = [0, 3], sizes = [8, 1], strides = [1, 1]} : vector<8x4xf32> to vector<8x1xf32>
    %83 = vector.extract_strided_slice %6 {offsets = [3, 0], sizes = [1, 2], strides = [1, 1]} : vector<4x2xf32> to vector<1x2xf32>
    %84 = vector.broadcast %82 : vector<8x1xf32> to vector<8x2xf32>
    %85 = vector.broadcast %83 : vector<1x2xf32> to vector<8x2xf32>
    %86 = arith.mulf %84, %85 : vector<8x2xf32>
    %87 = arith.addf %81, %86 : vector<8x2xf32>
    %cst = arith.constant dense<0xFF800000> : vector<8xf32>
    %88 = vector.multi_reduction <maximumf>, %87, %cst [1] : vector<8x2xf32> to vector<8xf32>
    %89 = vector.shape_cast %88 : vector<8xf32> to vector<8x1xf32>
    %90 = vector.broadcast %89 : vector<8x1xf32> to vector<8x2xf32>
    %91 = arith.subf %87, %90 : vector<8x2xf32>
    %92 = math.exp %91 : vector<8x2xf32>
    %cst_3 = arith.constant dense<0.000000e+00> : vector<8xf32>
    %93 = vector.multi_reduction <add>, %92, %cst_3 [1] : vector<8x2xf32> to vector<8xf32>
    %94 = vector.shape_cast %93 : vector<8xf32> to vector<8x1xf32>
    %95 = tpu.reciprocal %94 : vector<8x1xf32> -> vector<8x1xf32>
    %96 = vector.broadcast %95 : vector<8x1xf32> to vector<8x2xf32>
    %97 = arith.mulf %92, %96 : vector<8x2xf32>
    %c0_4 = arith.constant 0 : index
    %c0_5 = arith.constant 0 : index
    %98 = vector.load %arg2[%c0_4, %c0_5] : memref<8x2xf32, #tpu.memory_space<vmem>>, vector<8x2xf32>
    tpu.vector_store %arg2[%c0_4, %c0_5], %97 {strides = array<i32>} : memref<8x2xf32, #tpu.memory_space<vmem>>, vector<8x2xf32>,
    return
  }
}

</mosaic_0001>

<bundles_post_ra>
// kernel: tpu_custom_call.1
= control target key start
LH: loop header
LB: loop body
LE: loop exit
PB: predicated region body
PF: predicated region fallthrough
CT: control target
= control target key end

     0   :  { %v192_v0 = vmov 0   ;;  %v193_v2 = vmov 2   ;;  %v194_v3 = vmov 1   ;;  %v195_v4 = vmov 3   ;;  %s246_s0 = inlined_call_operand.vmem [shape: f32[8,4], index: 0, kind: input, shape index: {}]   ;;  %s247_s1 = inlined_call_operand.vmem [shape: f32[15,4], index: 1, kind: input, shape index: {}]   ;;  %s248_s2 = inlined_call_operand.vmem [shape: f32[8,2], index: 2, kind: output, shape index: {}]  }
   0x1   :  { %172 = vset.pattern.permute.xlu0 %v192_v0  ;;  %v11_v1 = vld [vmem:[%s246_s0] sm:$0xff]  ;;  %174 = vset.pattern.permute.xlu1 %v193_v2  ;;  %v14_v5 = vlaneseq  ;;  %v13_v33 = vld [vmem:[%s247_s1 + $0x8] sm:$0x7f]  ;;  %vm151_vm0 = vcmask 15360  }
   0x2   :  { %20 = vperm.xlu0 %172, %v11_v1   ;;  %40 = vperm.xlu1 %174, %v11_v1   ;;  %v12_v8 = vld [vmem:[%s247_s1] sm:$0xff] }
   0x3   :  { %v216_v6 = vshrl.u32 %v14_v5, 7 }
   0x5   :  { %v25_v7 = vsub.s32 0, %v216_v6  ;;  %v16_v9 = vsub.s32 4, %v216_v6  ;;  %v35_v11 = vsub.s32 1, %v216_v6  ;;  %v45_v13 = vsub.s32 2, %v216_v6 }
   0x6   :  { %173 = vset.pattern.permute.xlu0 %v194_v3  ;;  %175 = vset.pattern.permute.xlu1 %v195_v4  ;;  %v55_v15 = vsub.s32 3, %v216_v6  ;;  %v71_v31 = vsub.s32 5, %v216_v6  ;;  %v81_v32 = vsub.s32 6, %v216_v6  ;;  %v91_v35 = vsub.s32 7, %v216_v6 }
   0x7   :  { %30 = vperm.xlu0 %173, %v11_v1   ;;  %50 = vperm.xlu1 %175, %v11_v1   ;;  %v26_v10 = vrot.slane %v12_v8, %v25_v7  ;;  %v17_v16 = vrot.slane %v12_v8, %v16_v9  ;;  %v36_v18 = vrot.slane %v12_v8, %v35_v11 }
   0x8   :  { %v46_v19 = vrot.slane %v12_v8, %v45_v13  ;;  %v56_v20 = vrot.slane %v12_v8, %v55_v15  ;;  %v72_v34 = vrot.slane %v12_v8, %v71_v31  ;;  %v82_v36 = vrot.slane %v12_v8, %v81_v32 }
   0x9   :  { %v63_v37 = vrot.slane %v13_v33, %v35_v11  ;;  %v92_v41 = vrot.slane %v12_v8, %v91_v35  ;;  %v102_v44 = vrot.slane %v13_v33, %v25_v7  ;;  %v118_v53 = vrot.slane %v13_v33, %v45_v13 }
   0xa   :  { %v109_v55 = vrot.slane %v13_v33, %v81_v32  ;;  %v128_v57 = vrot.slane %v13_v33, %v55_v15  ;;  %v138_v58 = vrot.slane %v13_v33, %v16_v9  ;;  %v148_v63 = vrot.slane %v13_v33, %v71_v31 }
   0xb   :  { %176 = vset.pattern.permute.xlu1 %v192_v0 }
  0x81   :  { %v21_v12 = vpop.permute.xlu0 %20  ;;  %v41_v14 = vpop.permute.xlu1 %40 }
  0x82   :  { %v27_v17 = vmul.f32 %v26_v10, %v21_v12  ;;  %v47_v25 = vmul.f32 %v46_v19, %v41_v14 }
  0x84   :  { %v28_v23 = vadd.f32 %v27_v17, %v17_v16 }
  0x86   :  { %v31_v21 = vpop.permute.xlu0 %30  ;;  %v51_v22 = vpop.permute.xlu1 %50 }
  0x87   :  { %v37_v24 = vmul.f32 %v36_v18, %v31_v21  ;;  %v57_v27 = vmul.f32 %v56_v20, %v51_v22 }
  0x89   :  { %v38_v26 = vadd.f32 %v37_v24, %v28_v23 }
  0x8b   :  { %v48_v28 = vadd.f32 %v47_v25, %v38_v26 }
  0x8d   :  { %v58_v29 = vadd.f32 %v57_v27, %v48_v28 }
  0x8f   :  { %184 = vtanh.f32 %v58_v29 }
  0x99   :  { %v185_v30 = vpop.eup %184 }
  0x9a   :  { %76 = vperm.xlu0 %173, %v185_v30   ;;  %66 = vperm.xlu1 %176, %v185_v30  }
  0x9e   :  { %178 = vset.pattern.permute.xlu0 %v195_v4  ;;  %177 = vset.pattern.permute.xlu1 %v193_v2 }
  0x9f   :  { %96 = vperm.xlu0 %178, %v185_v30   ;;  %86 = vperm.xlu1 %177, %v185_v30  }
  0xa3   :  { %181 = vset.pattern.permute.xlu0 %v193_v2  ;;  %179 = vset.pattern.permute.xlu1 %v192_v0 }
 0x119   :  { %v77_v38 = vpop.permute.xlu0 %76  ;;  %v67_v39 = vpop.permute.xlu1 %66 }
 0x11a   :  { %v73_v40 = vmul.f32 %v72_v34, %v67_v39  ;;  %v83_v42 = vmul.f32 %v82_v36, %v77_v38 }
 0x11c   :  { %v74_v43 = vadd.f32 %v73_v40, %v63_v37 }
 0x11e   :  { %v97_v45 = vpop.permute.xlu0 %96  ;;  %v84_v46 = vadd.f32 %v83_v42, %v74_v43  ;;  %v87_v47 = vpop.permute.xlu1 %86 }
 0x11f   :  { %v93_v48 = vmul.f32 %v92_v41, %v87_v47  ;;  %v103_v49 = vmul.f32 %v102_v44, %v97_v45 }
 0x121   :  { %v94_v50 = vadd.f32 %v93_v48, %v84_v46 }
 0x123   :  { %v104_v51 = vadd.f32 %v103_v49, %v94_v50 }
 0x125   :  { %186 = vtanh.f32 %v104_v51 }
 0x12f   :  { %v187_v52 = vpop.eup %186 }
 0x130   :  { %132 = vperm.xlu0 %181, %v187_v52   ;;  %112 = vperm.xlu1 %179, %v187_v52  }
 0x134   :  { %180 = vset.pattern.permute.xlu1 %v194_v3  ;;  %183 = vset.pattern.permute.xlu0 %v195_v4 }
 0x135   :  { %122 = vperm.xlu1 %180, %v187_v52  }
 0x139   :  { %182 = vset.pattern.permute.xlu1 %v195_v4 }
 0x13a   :  { %142 = vperm.xlu1 %182, %v187_v52  }
 0x1af   :  { %v113_v54 = vpop.permute.xlu1 %112  ;;  %v133_v59 = vpop.permute.xlu0 %132 }
 0x1b0   :  { %v119_v56 = vmul.f32 %v118_v53, %v113_v54  ;;  %v139_v0 = vmul.f32 %v138_v58, %v133_v59 }
 0x1b2   :  { %v120_v61 = vadd.f32 %v119_v56, %v109_v55 }
 0x1b4   :  { %v123_v60 = vpop.permute.xlu1 %122 }
 0x1b5   :  { %v129_v62 = vmul.f32 %v128_v57, %v123_v60 }
 0x1b7   :  { %v130_v1 = vadd.f32 %v129_v62, %v120_v61 }
 0x1b9   :  { %v143_v2 = vpop.permute.xlu1 %142  ;;  %v140_v3 = vadd.f32 %v139_v0, %v130_v1 }
 0x1ba   :  { %v149_v5 = vmul.f32 %v148_v63, %v143_v2 }
 0x1bc   :  { %v150_v4 = vadd.f32 %v149_v5, %v140_v3 }
 0x1be   :  { %v152_v7 = vsel %vm151_vm0, %v150_v4, -inf }
 0x1bf   :  { %153 = vmax.xlane.f32.xlu1 %v152_v7 }
 0x24c   :  { %v154_v8 = vpop.xlane.xlu1 %153 }
 0x24d   :  { %v155_v10 = vsub.f32 %v150_v4, %v154_v8 }
 0x24f   :  { %v156_v11 = vmul.f32 1.442695, %v155_v10 }
 0x251   :  { %188 = vpow2.f32 %v156_v11 }
 0x25b   :  { %v189_v6 = vpop.eup %188 }
 0x25c   :  { %v158_v9 = vsel %vm151_vm0, %v189_v6, 0.0 }
 0x25d   :  { %159 = vadd.xlane.f32.xlu0 %v158_v9 }
 0x2ea   :  { %v160_v12 = vpop.xlane.xlu0 %159 }
 0x2eb   :  { %190 = vrcp.f32 %v160_v12 }
 0x2f5   :  { %v191_v13 = vpop.eup %190 }
 0x2f6   :  { %v162_v14 = vmul.f32 %v191_v13, %v189_v6 }
 0x2f8   :  { %163 = vst.msk [vmem:[%s248_s2] sm:$0xff] %vm151_vm0, %v162_v14 }

</bundles_post_ra>
